<compile_context>
chip_gen: v5e
topology: v5e:2x2
jax: 0.10.0
libtpu: 0.0.40
codegen_flags: <defaults>
</compile_context>

<pallas_src>
import jax
import jax.numpy as jnp
from jax import lax
from jax.experimental import pallas as pl
from jax.experimental.pallas import tpu as pltpu


E_PAD = 64          # embedding dim padded 50 -> 64 (zero padding is numerically exact)
MAX_TILE_B = 4096   # max batch tile (multiple of 128); ~1 MiB bf16 input per buffer


def _round_up(n, m):
    return ((n + m - 1) // m) * m


def _choose_tile_b(batch):
    """Largest tile <= MAX_TILE_B that still leaves >= 2 grid steps (v7x megacore),
    rounded to a multiple of 128 so every block stays (8,128)/lane aligned."""
    tile = _round_up(max((batch + 1) // 2, 128), 128)
    return min(MAX_TILE_B, tile)


def deepcf_mlp_kernel(x_ref, w1_ref, b1_ref, w2_ref, b2_ref, w3_ref, b3_ref, out_ref):
    # ----- Linear(2E -> H1) + ReLU.  Single fused K=128 dot (concat done in wrapper).
    h1 = jnp.dot(x_ref[...], w1_ref[...], preferred_element_type=jnp.float32) + b1_ref[...]
    h1 = jnp.maximum(h1, 0.0).astype(jnp.bfloat16)
    # TODO(synk): nn.Dropout(0.2) is identity at inference; not applied here.

    # ----- Linear(H1 -> H2) + ReLU -----
    h2 = jnp.dot(h1, w2_ref[...], preferred_element_type=jnp.float32) + b2_ref[...]
    h2 = jnp.maximum(h2, 0.0)                                   # (TILE_B, H2) f32

    # ----- Linear(H2 -> 1) + Sigmoid, lane-dense.
    # NT contraction (same pattern as q @ k.T): (1, H2) x (TILE_B, H2) -> (1, TILE_B).
    logits = lax.dot_general(w3_ref[...], h2, (((1,), (1,)), ((), ())),
                             preferred_element_type=jnp.float32) + b3_ref[0]
    out_ref[...] = jax.nn.sigmoid(logits)[None]                 # (1, 1, TILE_B)


@jax.jit
def deepcf_forward(user_ids, item_ids, prep):
    B = user_ids.shape[0]
    tile_b = _choose_tile_b(B)
    num_tiles = pl.cdiv(B, tile_b)
    b_pad = num_tiles * tile_b

    # Pad the id vectors (index 0) so B is a multiple of tile_b; tail rows are
    # computed on real (but irrelevant) embeddings and sliced off below.
    uid = jnp.pad(user_ids, (0, b_pad - B))
    iid = jnp.pad(item_ids, (0, b_pad - B))

    # Embedding gather + concat (plain JAX glue; bf16 tables halve HBM traffic).
    # TODO(synk): fuse this gather into the kernel to drop the extra HBM round
    # trip of the gathered (B_pad, 128) slab.
    x = jnp.concatenate([prep["user_embedding"][uid],
                         prep["item_embedding"][iid]], axis=1)   # (b_pad, 128) bf16

    K = 2 * E_PAD
    H1 = prep["w2"].shape[0]
    H2 = prep["w2"].shape[1]

    # Weights use a constant (0, 0) index map -> stay VMEM-resident across the grid.
    resident = lambda shape: pl.BlockSpec(shape, lambda i: (0, 0))

    out = pl.pallas_call(
        deepcf_mlp_kernel,
        out_shape=jax.ShapeDtypeStruct((num_tiles, 1, tile_b), jnp.float32),
        grid_spec=pltpu.PrefetchScalarGridSpec(
            num_scalar_prefetch=0,
            grid=(num_tiles,),
            in_specs=[
                pl.BlockSpec((tile_b, K), lambda i: (i, 0)),        # fused emb tile, bf16
                resident((K, H1)),                                   # fused w1, bf16
                resident((1, H1)),                                   # b1, f32
                resident((H1, H2)),                                  # w2, bf16
                resident((1, H2)),                                   # b2, f32
                resident((1, H2)),                                   # w3 as a row, f32
                pl.BlockSpec(memory_space=pltpu.MemorySpace.SMEM),   # b3 scalar (1,), f32
            ],
            out_specs=pl.BlockSpec((1, 1, tile_b), lambda i: (i, 0, 0)),
        ),
        compiler_params=pltpu.CompilerParams(
            dimension_semantics=("parallel",)),
    )(x, prep["w1"], prep["b1"], prep["w2"], prep["b2"], prep["w3_row"], prep["b3"])

    # TODO(synk): torch `.squeeze()` returns a 0-d tensor for B == 1; we return (B,).
    return out.reshape(-1)[:B]


def init_params(key, num_users, num_items, embedding_dim=50, hidden_dims=(128, 64)):
    """Logical (PyTorch-equivalent) parameters, all float32."""
    keys = jax.random.split(key, 8)
    E, H1, H2 = embedding_dim, hidden_dims[0], hidden_dims[1]
    scale = 0.1
    return {
        "user_embedding": scale * jax.random.normal(keys[0], (num_users, E), jnp.float32),
        "item_embedding": scale * jax.random.normal(keys[1], (num_items, E), jnp.float32),
        "w1": scale * jax.random.normal(keys[2], (2 * E, H1), jnp.float32),
        "b1": scale * jax.random.normal(keys[3], (1, H1), jnp.float32),
        "w2": scale * jax.random.normal(keys[4], (H1, H2), jnp.float32),
        "b2": scale * jax.random.normal(keys[5], (1, H2), jnp.float32),
        "w3": scale * jax.random.normal(keys[6], (H2, 1), jnp.float32),
        "b3": scale * jax.random.normal(keys[7], (1, 1), jnp.float32),
    }


def prepare_params(params):
    """Kernel-ready params: E zero-padded 50->64, w1 fused into one (128, H1) matrix
    aligned to the padded [user|item] concat, embeddings + matmul weights bf16
    (biases / final row / epilogue stay f32)."""
    E = params["user_embedding"].shape[1]
    H1 = params["w1"].shape[1]
    pad_cols = lambda t: jnp.pad(t, ((0, 0), (0, E_PAD - E)))
    w1 = params["w1"]                                              # (2E, H1)
    w1_fused = jnp.zeros((2 * E_PAD, H1), jnp.float32)
    w1_fused = w1_fused.at[:E].set(w1[:E])                          # user rows -> cols 0..E-1
    w1_fused = w1_fused.at[E_PAD:E_PAD + E].set(w1[E:])             # item rows -> cols 64..64+E-1
    return {
        "user_embedding": pad_cols(params["user_embedding"]).astype(jnp.bfloat16),
        "item_embedding": pad_cols(params["item_embedding"]).astype(jnp.bfloat16),
        "w1": w1_fused.astype(jnp.bfloat16),                        # (128, H1)
        "b1": params["b1"].astype(jnp.float32),
        "w2": params["w2"].astype(jnp.bfloat16),
        "b2": params["b2"].astype(jnp.float32),
        "w3_row": params["w3"].T.astype(jnp.float32),               # (1, H2)
        "b3": params["b3"].reshape(-1).astype(jnp.float32),         # (1,)
    }


def deepcf_reference_f32(user_ids, item_ids, params):
    """Pure-JAX float32 reference of the original module (eval mode)."""
    ue = params["user_embedding"][user_ids]
    ie = params["item_embedding"][item_ids]
    x = jnp.concatenate([ue, ie], axis=1)
    h1 = jnp.maximum(x @ params["w1"] + params["b1"], 0.0)
    h2 = jnp.maximum(h1 @ params["w2"] + params["b2"], 0.0)
    return jax.nn.sigmoid(h2 @ params["w3"] + params["b3"]).squeeze(-1)


def deepcf_reference_bf16(user_ids, item_ids, prep):
    """Pure-JAX mirror of the kernel arithmetic (bf16 storage, f32 accumulation)."""
    x = jnp.concatenate([prep["user_embedding"][user_ids],
                         prep["item_embedding"][item_ids]], axis=1)
    h1 = jnp.dot(x, prep["w1"], preferred_element_type=jnp.float32) + prep["b1"]
    h1 = jnp.maximum(h1, 0.0).astype(jnp.bfloat16)
    h2 = jnp.dot(h1, prep["w2"], preferred_element_type=jnp.float32) + prep["b2"]
    h2 = jnp.maximum(h2, 0.0)
    logits = lax.dot_general(prep["w3_row"], h2, (((1,), (1,)), ((), ())),
                             preferred_element_type=jnp.float32)[0] + prep["b3"][0]
    return jax.nn.sigmoid(logits)


if __name__ == "__main__":
    key = jax.random.PRNGKey(0)
    k_params, k_u, k_i = jax.random.split(key, 3)

    num_users, num_items = 200, 100
    batch = 1000   # -> tile_b = 512, grid = 2 tiles, exercises tail padding

    params = init_params(k_params, num_users, num_items,
                         embedding_dim=50, hidden_dims=(128, 64))
    prep = prepare_params(params)

    user_ids = jax.random.randint(k_u, (batch,), 0, num_users, dtype=jnp.int32)
    item_ids = jax.random.randint(k_i, (batch,), 0, num_items, dtype=jnp.int32)

    out = deepcf_forward(user_ids, item_ids, prep)
    out = jax.block_until_ready(out)
    assert out.shape == (batch,)

    ref_bf16 = deepcf_reference_bf16(user_ids, item_ids, prep)   # same numerics as kernel
    ref_f32 = deepcf_reference_f32(user_ids, item_ids, params)   # original f32 module
    assert jnp.allclose(out, ref_bf16, atol=3e-3, rtol=3e-3), \
        float(jnp.max(jnp.abs(out - ref_bf16)))
    assert jnp.allclose(out, ref_f32, atol=3e-2, rtol=3e-2), \
        float(jnp.max(jnp.abs(out - ref_f32)))

    print("KERNEL_OK")
</pallas_src>

<mosaic_0001>
module attributes {stable_mosaic.version = 11 : i64} {
  func.func @deepcf_mlp_kernel(%arg0: i32, %arg1: memref<512x128xbf16, #tpu.memory_space<vmem>>, %arg2: memref<128x128xbf16, #tpu.memory_space<vmem>>, %arg3: memref<1x128xf32, #tpu.memory_space<vmem>>, %arg4: memref<128x64xbf16, #tpu.memory_space<vmem>>, %arg5: memref<1x64xf32, #tpu.memory_space<vmem>>, %arg6: memref<1x64xf32, #tpu.memory_space<vmem>>, %arg7: memref<1xf32, #tpu.memory_space<smem>>, %arg8: memref<1x1x512xf32, #tpu.memory_space<vmem>>) attributes {dimension_semantics = [#tpu.dimension_semantics<parallel>], iteration_bounds = array<i64: 2>, scalar_prefetch = 0 : i64, scratch_operands = 0 : i64, tpu.core_type = #tpu.core_type<tc>, window_params = [{transform_indices = @transform_0, window_bounds = array<i64: 512, 128>}, {pipeline_mode = #tpu.pipeline_mode<synchronous>, transform_indices = @transform_1, window_bounds = array<i64: 128, 128>}, {pipeline_mode = #tpu.pipeline_mode<synchronous>, transform_indices = @transform_2, window_bounds = array<i64: 1, 128>}, {pipeline_mode = #tpu.pipeline_mode<synchronous>, transform_indices = @transform_3, window_bounds = array<i64: 128, 64>}, {pipeline_mode = #tpu.pipeline_mode<synchronous>, transform_indices = @transform_4, window_bounds = array<i64: 1, 64>}, {pipeline_mode = #tpu.pipeline_mode<synchronous>, transform_indices = @transform_5, window_bounds = array<i64: 1, 64>}, {transform_indices = @transform_6, window_bounds = array<i64: 1>}, {transform_indices = @transform_7, window_bounds = array<i64: 1, 1, 512>}]} {
    %c0 = arith.constant 0 : index
    %c0_0 = arith.constant 0 : index
    %0 = vector.load %arg1[%c0, %c0_0] : memref<512x128xbf16, #tpu.memory_space<vmem>>, vector<512x128xbf16>
    %c0_1 = arith.constant 0 : index
    %c0_2 = arith.constant 0 : index
    %1 = vector.load %arg2[%c0_1, %c0_2] : memref<128x128xbf16, #tpu.memory_space<vmem>>, vector<128x128xbf16>
    %cst = arith.constant dense<0.000000e+00> : vector<512x128xf32>
    %2 = tpu.matmul %0, %1, %cst {dimension_numbers = #tpu.dot_dimension_numbers<[1], [0], [0], [1], [0, 0, 1, 1], [], []>} : vector<512x128xbf16>, vector<128x128xbf16>, vector<512x128xf32> -> vector<512x128xf32>
    %c0_3 = arith.constant 0 : index
    %c0_4 = arith.constant 0 : index
    %3 = vector.load %arg3[%c0_3, %c0_4] : memref<1x128xf32, #tpu.memory_space<vmem>>, vector<1x128xf32>
    %4 = vector.broadcast %3 : vector<1x128xf32> to vector<512x128xf32>
    %5 = arith.addf %2, %4 : vector<512x128xf32>
    %cst_5 = arith.constant 0.000000e+00 : f32
    %6 = vector.broadcast %cst_5 : f32 to vector<512x128xf32>
    %7 = arith.maximumf %5, %6 : vector<512x128xf32>
    %8 = arith.truncf %7 : vector<512x128xf32> to vector<512x128xbf16>
    %c0_6 = arith.constant 0 : index
    %c0_7 = arith.constant 0 : index
    %9 = vector.load %arg4[%c0_6, %c0_7] : memref<128x64xbf16, #tpu.memory_space<vmem>>, vector<128x64xbf16>
    %cst_8 = arith.constant dense<0.000000e+00> : vector<512x64xf32>
    %10 = tpu.matmul %8, %9, %cst_8 {dimension_numbers = #tpu.dot_dimension_numbers<[1], [0], [0], [1], [0, 0, 1, 1], [], []>} : vector<512x128xbf16>, vector<128x64xbf16>, vector<512x64xf32> -> vector<512x64xf32>
    %c0_9 = arith.constant 0 : index
    %c0_10 = arith.constant 0 : index
    %11 = vector.load %arg5[%c0_9, %c0_10] : memref<1x64xf32, #tpu.memory_space<vmem>>, vector<1x64xf32>
    %12 = vector.broadcast %11 : vector<1x64xf32> to vector<512x64xf32>
    %13 = arith.addf %10, %12 : vector<512x64xf32>
    %cst_11 = arith.constant 0.000000e+00 : f32
    %14 = vector.broadcast %cst_11 : f32 to vector<512x64xf32>
    %15 = arith.maximumf %13, %14 : vector<512x64xf32>
    %c0_12 = arith.constant 0 : index
    %c0_13 = arith.constant 0 : index
    %16 = vector.load %arg6[%c0_12, %c0_13] : memref<1x64xf32, #tpu.memory_space<vmem>>, vector<1x64xf32>
    %cst_14 = arith.constant dense<0.000000e+00> : vector<1x512xf32>
    %17 = tpu.matmul %16, %15, %cst_14 {dimension_numbers = #tpu.dot_dimension_numbers<[1], [1], [0], [0], [0, 0, 1, 0], [], []>} : vector<1x64xf32>, vector<512x64xf32>, vector<1x512xf32> -> vector<1x512xf32>
    %c0_15 = arith.constant 0 : index
    %18 = memref.load %arg7[%c0_15] : memref<1xf32, #tpu.memory_space<smem>>
    %19 = vector.broadcast %18 : f32 to vector<1x512xf32>
    %20 = arith.addf %17, %19 : vector<1x512xf32>
    %21 = arith.negf %20 : vector<1x512xf32>
    %22 = math.exp %21 : vector<1x512xf32>
    %cst_16 = arith.constant 1.000000e+00 : f32
    %23 = vector.broadcast %cst_16 : f32 to vector<1x512xf32>
    %24 = arith.addf %23, %22 : vector<1x512xf32>
    %25 = arith.divf %23, %24 : vector<1x512xf32>
    %26 = vector.shape_cast %25 : vector<1x512xf32> to vector<1x1x512xf32>
    %c0_17 = arith.constant 0 : index
    %c0_18 = arith.constant 0 : index
    %c0_19 = arith.constant 0 : index
    %27 = vector.load %arg8[%c0_17, %c0_18, %c0_19] : memref<1x1x512xf32, #tpu.memory_space<vmem>>, vector<1x1x512xf32>
    tpu.vector_store %arg8[%c0_17, %c0_18, %c0_19], %26 {strides = array<i32>} : memref<1x1x512xf32, #tpu.memory_space<vmem>>, vector<1x1x512xf32>,
    return
  }
  func.func @transform_0(%arg0: i32) -> (i32, i32) {
    %c0_i32 = arith.constant 0 : i32
    %c0_i32_0 = arith.constant 0 : i32
    return %arg0, %c0_i32 : i32, i32
  }
  func.func @transform_1(%arg0: i32) -> (i32, i32) {
    %c0_i32 = arith.constant 0 : i32
    %c0_i32_0 = arith.constant 0 : i32
    %c0_i32_1 = arith.constant 0 : i32
    return %c0_i32, %c0_i32_0 : i32, i32
  }
  func.func @transform_2(%arg0: i32) -> (i32, i32) {
    %c0_i32 = arith.constant 0 : i32
    %c0_i32_0 = arith.constant 0 : i32
    %c0_i32_1 = arith.constant 0 : i32
    return %c0_i32, %c0_i32_0 : i32, i32
  }
  func.func @transform_3(%arg0: i32) -> (i32, i32) {
    %c0_i32 = arith.constant 0 : i32
    %c0_i32_0 = arith.constant 0 : i32
    %c0_i32_1 = arith.constant 0 : i32
    return %c0_i32, %c0_i32_0 : i32, i32
  }
  func.func @transform_4(%arg0: i32) -> (i32, i32) {
    %c0_i32 = arith.constant 0 : i32
    %c0_i32_0 = arith.constant 0 : i32
    %c0_i32_1 = arith.constant 0 : i32
    return %c0_i32, %c0_i32_0 : i32, i32
  }
  func.func @transform_5(%arg0: i32) -> (i32, i32) {
    %c0_i32 = arith.constant 0 : i32
    %c0_i32_0 = arith.constant 0 : i32
    %c0_i32_1 = arith.constant 0 : i32
    return %c0_i32, %c0_i32_0 : i32, i32
  }
  func.func @transform_6(%arg0: i32) -> i32 {
    %c0_i32 = arith.constant 0 : i32
    %c0_i32_0 = arith.constant 0 : i32
    return %c0_i32 : i32
  }
  func.func @transform_7(%arg0: i32) -> (i32, i32, i32) {
    %c0_i32 = arith.constant 0 : i32
    %c0_i32_0 = arith.constant 0 : i32
    %c0_i32_1 = arith.constant 0 : i32
    return %arg0, %c0_i32, %c0_i32_0 : i32, i32, i32
  }
}

</mosaic_0001>

<bundles_post_ra>
// kernel: deepcf_forward.1
= control target key start
LH: loop header
LB: loop body
LE: loop exit
PB: predicated region body
PF: predicated region fallthrough
CT: control target
= control target key end

     0   :  { %s2652_s0 = inlined_call_operand.vmem [shape: bf16[1024,128], index: 0, kind: input, shape index: {}]   ;;  %s2653_s1 = inlined_call_operand.vmem [shape: bf16[128,128], index: 1, kind: input, shape index: {}]   ;;  %s2654_s2 = inlined_call_operand.vmem [shape: f32[1,128], index: 2, kind: input, shape index: {}]   ;;  %s2655_s3 = inlined_call_operand.vmem [shape: bf16[128,64], index: 3, kind: input, shape index: {}]   ;;  %s2656_s4 = inlined_call_operand.vmem [shape: f32[1,64], index: 4, kind: input, shape index: {}]   ;;  %s2657_s5 = inlined_call_operand.vmem [shape: f32[1,64], index: 5, kind: input, shape index: {}]   ;;  %s2658_s6 = inlined_call_operand.<no memory space> [shape: f32[1], index: 6, kind: input, shape index: {}]   ;;  %s2659_s7 = inlined_call_operand.hbm [shape: f32[2,1,512], index: 7, kind: output, shape index: {}]  }
   0x1   :  { %12 = sst [smem:[#allocation2]] %s2658_s6 }
   0x2   :  { %13 = vsyncpa [#allocation4], 0 }
   0x3   :  { %15 = vsyncpa [#allocation4 + $0x1], 0  ;;  %s2122_s26 = smov 0   ;;  %s2124_s27 = smov 0  }
   0x4   :  { %s2126_s28 = smov 0   ;;  %s2128_s29 = smov 0  }
   0x5 LB: > { %s2143_s6 = sadd.s32 4294967295, %s2077_s29   ;;  %s1619_s30 = sadd.s32 4294967294, %s2077_s29   ;;  %s2077_s29 = sphi %s2128_s29, %s2671_s29   ;;  %s2073_s28 = sphi %s2126_s28, %s2670_s28   ;;  %s2069_s27 = sphi %s2124_s27, %s2669_s27   ;;  %s2065_s26 = sphi %s2122_s26, %s2668_s26  }
   0x6   : > { %s2147_s8 = sadd.s32 1, %s2077_s29   ;;  %s180_s9 = sadd.s32 1, %s2073_s28 }
   0x7   : > { %s177_s10 = ssub.s32 %s2077_s29, %s2147_s8  ;;  %p190_p0 = scmp.ne.s32.totalorder %s2073_s28, %s2069_s27 }
   0x8   : > { %p178_p1 = scmp.eq.s32.totalorder %s177_s10, 0  ;;  %p191_p2 = scmp.eq.s32.totalorder %s2143_s6, 1 }
   0x9   : > { %p196_p3 = scmp.ne.s32.totalorder %s2069_s27, %s2065_s26  ;;  %p197_p4 = scmp.eq.s32.totalorder %s1619_s30, 1 }
   0xa   : > { %s2158_s11 = scalar_select %p178_p1, %s2073_s28, %s180_s9  }
   0xb   : > { %p2160_p5 = por %p191_p2, %p190_p0  ;;  %p2164_p6 = por %p197_p4, %p196_p3 }
   0xc   : > { %p1622_p7 = scmp.ge.s32.totalorder %s2077_s29, 1  ;;  %p242_p8 = scmp.lt.s32.totalorder %s2077_s29, 3 }
   0xe   : > { %p243_p9 = pnand %p1622_p7, %p242_p8 }
   0xf   : > { %s1624_s22 = sshll.u32 (!%p243_p9), %s2143_s6, 6  ;;  %s1171_s9 = sld [smem:[#allocation2]] (!%p243_p9) }
  0x10   : > { %246 = sbr.rel (%p243_p9) target bundleno = 867 (0x363), region = 48  ;;  %p275_p10 = scmp.lt.s32.totalorder (!%p243_p9), %s1624_s22, 127 }
  0x11   : > { %s271_s10 = sand.u32 (!%p243_p9), 1, %s2069_s27   ;;  %s1891_s15 = sshll.u32 (!%p243_p9), %s2143_s6, 2 }
  0x12   : > { %s1555_s18 = scalar_lea.hbm (!%p243_p9), %s2659_s7, %s1891_s15  ;;  %s2035_s30 = scalar_lea.hbm (!%p243_p9), %s2659_s7, 8 }
  0x13   : > { %s1559_s21 = sshll.u32 (!%p243_p9), %s1555_s18, 4  ;;  %s1560_s21 = int_to_ptr.hbm [resolvable:$true] %s1559_s21 }
  0x14   : > { %s2029_s23 = sshra.s32 (!%p243_p9), %s1560_s21, 4  ;;  %s2030_s23 = int_to_ptr.hbm [resolvable:$true] %s2029_s23 }
  0x15   : > { %v1933_v0 = vld [vmem:[%s2653_s1 + $0x38] sm:$0xff]  ;;  %v1932_v1 = vld [vmem:[%s2653_s1 + $0x30] sm:$0xff]  ;;  %v1931_v2 = vld [vmem:[%s2653_s1 + $0x28] sm:$0xff]  ;;  %s2673_s22 = smov (!%p275_p10, %s1624_s22), 127  ;;  %vm1173_vm0 = vcmask 523264   ;;  %p2036_p0 = scmp.lt.s32.totalorder %s2030_s23, %s2659_s7 }
  0x16   : > { %604 = vmatpush.bf16.msra.mxu0 %v1933_v0  ;;  %1942 = vmatpush.bf16.msra.mxu2 %v1933_v0  ;;  %v1930_v3 = vld [vmem:[%s2653_s1 + $0x20] sm:$0xff]  ;;  %v1929_v4 = vld [vmem:[%s2653_s1 + $0x18] sm:$0xff]  ;;  %v1928_v5 = vld [vmem:[%s2653_s1 + $0x10] sm:$0xff]  ;;  %s1625_s14 = sshll.u32 %s2673_s22, 2  ;;  %s1545_s22 = scalar_lea.sflag [#allocation4], %s271_s10 }
  0x17   : > { %v1927_v6 = vld [vmem:[%s2653_s1 + $0x8] sm:$0xff]  ;;  %v1926_v7 = vld [vmem:[%s2653_s1] sm:$0xff]  ;;  %s2198_s19 = scalar_lea.vmem %s2652_s0, %s1625_s14  ;;  %v1941_v15 = vld [vmem:[%s2655_s3 + $0x38] sm:$0xff]  ;;  %s2607_s14 = sshll.u32 %s271_s10, 2 }
  0x18   : > { %v1894_v8 = vld [vmem:[%s2198_s19] sm:$0xff]  ;;  %v1895_v9 = vld [vmem:[%s2198_s19 + $0x8] sm:$0xff]  ;;  %v1896_v10 = vld [vmem:[%s2198_s19 + $0x10] sm:$0xff]  ;;  %937 = vmatpush.bf16.msra.mxu1 %v1941_v15  ;;  %1950 = vmatpush.bf16.msra.mxu3 %v1941_v15  ;;  %s273_s6 = scalar_lea.vmem [#allocation3], %s2607_s14 }
  0x19   : > { %v1897_v11 = vld [vmem:[%s2198_s19 + $0x18] sm:$0xff]  ;;  %v1898_v13 = vld [vmem:[%s2198_s19 + $0x20] sm:$0xff]  ;;  %v1899_v16 = vld [vmem:[%s2198_s19 + $0x28] sm:$0xff]  ;;  %s1557_s20 = sshll.u32 %s273_s6, 4  ;;  %s1558_s20 = int_to_ptr.vmem [resolvable:$true] %s1557_s20 }
  0x1a   : > { %605 = vmatpush.bf16.msra.mxu0 %v1932_v1  ;;  %1943 = vmatpush.bf16.msra.mxu2 %v1932_v1  ;;  %v1913_v12 = vld [vmem:[%s2198_s19 + $0x98] sm:$0xff]  ;;  %v1914_v14 = vld [vmem:[%s2198_s19 + $0xa0] sm:$0xff]  ;;  %v1940_v17 = vld [vmem:[%s2655_s3 + $0x30] sm:$0xff] }
  0x1b   : > { %v1915_v18 = vld [vmem:[%s2198_s19 + $0xa8] sm:$0xff]  ;;  %v1938_v20 = vld [vmem:[%s2655_s3 + $0x20] sm:$0xff]  ;;  %v1937_v21 = vld [vmem:[%s2655_s3 + $0x18] sm:$0xff] }
  0x1c   : > { %938 = vmatpush.bf16.msra.mxu1 %v1940_v17  ;;  %v1939_v19 = vld [vmem:[%s2655_s3 + $0x28] sm:$0xff]  ;;  %1951 = vmatpush.bf16.msra.mxu3 %v1940_v17  ;;  %v1900_v22 = vld [vmem:[%s2198_s19 + $0x30] sm:$0xff]  ;;  %v1934_v26 = vld [vmem:[%s2655_s3] sm:$0xff] }
  0x1d   : > { %v1936_v23 = vld [vmem:[%s2655_s3 + $0x10] sm:$0xff]  ;;  %v1935_v25 = vld [vmem:[%s2655_s3 + $0x8] sm:$0xff]  ;;  %v1901_v27 = vld [vmem:[%s2198_s19 + $0x38] sm:$0xff] }
  0x1e   : > { %606 = vmatpush.bf16.msra.mxu0 %v1931_v2  ;;  %1944 = vmatpush.bf16.msra.mxu2 %v1931_v2  ;;  %v1916_v24 = vld [vmem:[%s2198_s19 + $0xb0] sm:$0xff]  ;;  %v1917_v28 = vld [vmem:[%s2198_s19 + $0xb8] sm:$0xff]  ;;  %v1902_v29 = vld [vmem:[%s2198_s19 + $0x40] sm:$0xff] }
  0x1f   : > { %v1918_v31 = vld [vmem:[%s2198_s19 + $0xc0] sm:$0xff]  ;;  %v1903_v39 = vld [vmem:[%s2198_s19 + $0x48] sm:$0xff]  ;;  %v1904_v48 = vld [vmem:[%s2198_s19 + $0x50] sm:$0xff] }
  0x20   : > { %939 = vmatpush.bf16.msra.mxu1 %v1939_v19  ;;  %1952 = vmatpush.bf16.msra.mxu3 %v1939_v19  ;;  %v2242_v32 = vld [vmem:[%s2654_s2] ss:$0 sm:$0xff]  ;;  %v1919_v41 = vld [vmem:[%s2198_s19 + $0xc8] sm:$0xff]  ;;  %v1920_v50 = vld [vmem:[%s2198_s19 + $0xd0] sm:$0xff] }
  0x21   : > { %v1905_v57 = vld [vmem:[%s2198_s19 + $0x58] sm:$0xff]  ;;  %v1907_v19 = vld [vmem:[%s2198_s19 + $0x68] sm:$0xff] }
  0x22   : > { %607 = vmatpush.bf16.msra.mxu0 %v1930_v3  ;;  %1945 = vmatpush.bf16.msra.mxu2 %v1930_v3  ;;  %v1921_v59 = vld [vmem:[%s2198_s19 + $0xd8] sm:$0xff]  ;;  %v1906_v3 = vld [vmem:[%s2198_s19 + $0x60] sm:$0xff] }
  0x24   : > { %940 = vmatpush.bf16.msra.mxu1 %v1938_v20  ;;  %1953 = vmatpush.bf16.msra.mxu3 %v1938_v20 }
  0x26   : > { %608 = vmatpush.bf16.msra.mxu0 %v1929_v4  ;;  %1946 = vmatpush.bf16.msra.mxu2 %v1929_v4 }
  0x28   : > { %941 = vmatpush.bf16.msra.mxu1 %v1937_v21  ;;  %1954 = vmatpush.bf16.msra.mxu3 %v1937_v21 }
  0x2a   : > { %609 = vmatpush.bf16.msra.mxu0 %v1928_v5  ;;  %1947 = vmatpush.bf16.msra.mxu2 %v1928_v5 }
  0x2c   : > { %942 = vmatpush.bf16.msra.mxu1 %v1936_v23  ;;  %1955 = vmatpush.bf16.msra.mxu3 %v1936_v23 }
  0x2e   : > { %610 = vmatpush.bf16.msra.mxu0 %v1927_v6  ;;  %1948 = vmatpush.bf16.msra.mxu2 %v1927_v6 }
  0x30   : > { %943 = vmatpush.bf16.msra.mxu1 %v1935_v25  ;;  %1956 = vmatpush.bf16.msra.mxu3 %v1935_v25 }
  0x32   : > { %611 = vmatpush.bf16.msra.mxu0 %v1926_v7  ;;  %1949 = vmatpush.bf16.msra.mxu2 %v1926_v7 }
  0x34   : > { %944 = vmatpush.bf16.msra.mxu1 %v1934_v26  ;;  %1957 = vmatpush.bf16.msra.mxu3 %v1934_v26  ;;  %v1923_v26 = vld [vmem:[%s2198_s19 + $0xe8] sm:$0xff] }
  0x35   : > { %612 = vmatmul.bf16.vlgmr.msra.gmra.mxu0 %v1894_v8  ;;  %707 = vmatmul.bf16.vlgmr.msra.gmra.mxu2 %v1913_v12 }
  0x45   : > { %617 = vmatmul.bf16.gmra.mxu0 %v1895_v9  ;;  %712 = vmatmul.bf16.gmra.mxu2 %v1914_v14 }
  0x55   : > { %622 = vmatmul.bf16.gmra.mxu0 %v1896_v10  ;;  %717 = vmatmul.bf16.gmra.mxu2 %v1915_v18  ;;  %v1922_v10 = vld [vmem:[%s2198_s19 + $0xe0] sm:$0xff] }
  0x65   : > { %627 = vmatmul.bf16.gmra.mxu0 %v1897_v11  ;;  %722 = vmatmul.bf16.gmra.mxu2 %v1916_v24 }
  0x75   : > { %632 = vmatmul.bf16.gmra.mxu0 %v1898_v13  ;;  %727 = vmatmul.bf16.gmra.mxu2 %v1917_v28 }
  0x85   : > { %637 = vmatmul.bf16.gmra.mxu0 %v1899_v16  ;;  %732 = vmatmul.bf16.gmra.mxu2 %v1918_v31 }
  0x95   : > { %642 = vmatmul.bf16.gmra.mxu0 %v1900_v22  ;;  %737 = vmatmul.bf16.gmra.mxu2 %v1919_v41 }
  0xa5   : > { %647 = vmatmul.bf16.gmra.mxu0 %v1901_v27  ;;  %742 = vmatmul.bf16.gmra.mxu2 %v1920_v50 }
  0xb2   : > { %v613_v30 = vpop.f32.mrf.mxu0 }
  0xb3   : > { %v614_v33 = vadd.f32 %v2242_v32, %v613_v30 }
  0xb5   : > { %652 = vmatmul.bf16.gmra.mxu0 %v1902_v29  ;;  %v773_v36 = vmax.f32 %v614_v33, 0.0  ;;  %747 = vmatmul.bf16.gmra.mxu2 %v1921_v59  ;;  %v1925_v59 = vld [vmem:[%s2198_s19 + $0xf8] sm:$0xff] }
  0xb8   : > { %v708_v61 = vpop.f32.mrf.mxu2 }
  0xb9   : > { %v709_v6 = vadd.f32 %v2242_v32, %v708_v61 }
  0xba   : > { %v615_v34 = vpop.f32.mrf.mxu0 }
  0xbb   : > { %v616_v35 = vadd.f32 %v2242_v32, %v615_v34  ;;  %v811_v8 = vmax.f32 %v709_v6, 0.0 }
  0xbd   : > { %v774_v37 = vmax.f32 %v616_v35, 0.0 }
  0xbf   : > { %v837_v38 = vpack.c.bf16 %v774_v37, %v773_v36  ;;  %v1908_v36 = vld [vmem:[%s2198_s19 + $0x70] sm:$0xff] }
  0xc0   : > { %v710_v4 = vpop.f32.mrf.mxu2 }
  0xc1   : > { %945 = vmatmul.bf16.vlgmr.msra.gmra.mxu1 %v837_v38  ;;  %v711_v7 = vadd.f32 %v2242_v32, %v710_v4 }
  0xc2   : > { %v618_v40 = vpop.f32.mrf.mxu0 }
  0xc3   : > { %v619_v42 = vadd.f32 %v2242_v32, %v618_v40  ;;  %v812_v9 = vmax.f32 %v711_v7, 0.0 }
  0xc5   : > { %657 = vmatmul.bf16.gmra.mxu0 %v1903_v39  ;;  %v775_v45 = vmax.f32 %v619_v42, 0.0  ;;  %752 = vmatmul.bf16.gmra.mxu2 %v1922_v10  ;;  %v856_v11 = vpack.c.bf16 %v812_v9, %v811_v8 }
  0xc7   : > { %1040 = vmatmul.bf16.vlgmr.msra.gmra.mxu3 %v856_v11 }
  0xc8   : > { %v713_v13 = vpop.f32.mrf.mxu2 }
  0xc9   : > { %v714_v22 = vadd.f32 %v2242_v32, %v713_v13 }
  0xca   : > { %v620_v43 = vpop.f32.mrf.mxu0 }
  0xcb   : > { %v621_v44 = vadd.f32 %v2242_v32, %v620_v43  ;;  %v813_v24 = vmax.f32 %v714_v22, 0.0  ;;  %v1924_v43 = vld [vmem:[%s2198_s19 + $0xf0] sm:$0xff] }
  0xcd   : > { %v776_v46 = vmax.f32 %v621_v44, 0.0 }
  0xcf   : > { %v838_v47 = vpack.c.bf16 %v776_v46, %v775_v45 }
  0xd0   : > { %v715_v20 = vpop.f32.mrf.mxu2 }
  0xd1   : > { %950 = vmatmul.bf16.gmra.mxu1 %v838_v47  ;;  %v716_v23 = vadd.f32 %v2242_v32, %v715_v20 }
  0xd2   : > { %v623_v49 = vpop.f32.mrf.mxu0 }
  0xd3   : > { %v624_v51 = vadd.f32 %v2242_v32, %v623_v49  ;;  %v814_v25 = vmax.f32 %v716_v23, 0.0 }
  0xd5   : > { %662 = vmatmul.bf16.gmra.mxu0 %v1904_v48  ;;  %v777_v54 = vmax.f32 %v624_v51, 0.0  ;;  %757 = vmatmul.bf16.gmra.mxu2 %v1923_v26  ;;  %v857_v27 = vpack.c.bf16 %v814_v25, %v813_v24 }
  0xd7   : > { %1045 = vmatmul.bf16.gmra.mxu3 %v857_v27 }
  0xd8   : > { %v718_v29 = vpop.f32.mrf.mxu2 }
  0xd9   : > { %v719_v39 = vadd.f32 %v2242_v32, %v718_v29 }
  0xda   : > { %v625_v52 = vpop.f32.mrf.mxu0 }
  0xdb   : > { %v626_v53 = vadd.f32 %v2242_v32, %v625_v52  ;;  %v815_v41 = vmax.f32 %v719_v39, 0.0  ;;  %v1909_v52 = vld [vmem:[%s2198_s19 + $0x78] sm:$0xff]  ;;  %v1912_v39 = vld [vmem:[%s2198_s19 + $0x90] sm:$0xff] }
  0xdd   : > { %v778_v55 = vmax.f32 %v626_v53, 0.0 }
  0xdf   : > { %v839_v56 = vpack.c.bf16 %v778_v55, %v777_v54 }
  0xe0   : > { %v720_v37 = vpop.f32.mrf.mxu2 }
  0xe1   : > { %955 = vmatmul.bf16.gmra.mxu1 %v839_v56  ;;  %v721_v40 = vadd.f32 %v2242_v32, %v720_v37 }
  0xe2   : > { %v628_v58 = vpop.f32.mrf.mxu0 }
  0xe3   : > { %v629_v60 = vadd.f32 %v2242_v32, %v628_v58  ;;  %v816_v42 = vmax.f32 %v721_v40, 0.0 }
  0xe5   : > { %667 = vmatmul.bf16.gmra.mxu0 %v1905_v57  ;;  %v779_v0 = vmax.f32 %v629_v60, 0.0  ;;  %762 = vmatmul.bf16.gmra.mxu2 %v1924_v43  ;;  %v858_v44 = vpack.c.bf16 %v816_v42, %v815_v41 }
  0xe7   : > { %1050 = vmatmul.bf16.gmra.mxu3 %v858_v44 }
  0xe8   : > { %v723_v46 = vpop.f32.mrf.mxu2 }
  0xe9   : > { %v724_v55 = vadd.f32 %v2242_v32, %v723_v46 }
  0xea   : > { %v630_v62 = vpop.f32.mrf.mxu0 }
  0xeb   : > { %v631_v63 = vadd.f32 %v2242_v32, %v630_v62  ;;  %v817_v57 = vmax.f32 %v724_v55, 0.0 }
  0xed   : > { %v780_v1 = vmax.f32 %v631_v63, 0.0 }
  0xef   : > { %v840_v2 = vpack.c.bf16 %v780_v1, %v779_v0 }
  0xf0   : > { %v725_v53 = vpop.f32.mrf.mxu2 }
  0xf1   : > { %960 = vmatmul.bf16.gmra.mxu1 %v840_v2  ;;  %v726_v56 = vadd.f32 %v2242_v32, %v725_v53 }
  0xf2   : > { %v633_v5 = vpop.f32.mrf.mxu0 }
  0xf3   : > { %v634_v12 = vadd.f32 %v2242_v32, %v633_v5  ;;  %v818_v58 = vmax.f32 %v726_v56, 0.0  ;;  %v1910_v5 = vld [vmem:[%s2198_s19 + $0x80] sm:$0xff] }
  0xf5   : > { %672 = vmatmul.bf16.gmra.mxu0 %v1906_v3  ;;  %v781_v16 = vmax.f32 %v634_v12, 0.0  ;;  %767 = vmatmul.bf16.gmra.mxu2 %v1925_v59  ;;  %v859_v60 = vpack.c.bf16 %v818_v58, %v817_v57 }
  0xf7   : > { %1055 = vmatmul.bf16.gmra.mxu3 %v859_v60 }
  0xf8   : > { %v728_v62 = vpop.f32.mrf.mxu2 }
  0xf9   : > { %v729_v7 = vadd.f32 %v2242_v32, %v728_v62 }
  0xfa   : > { %v635_v14 = vpop.f32.mrf.mxu0 }
  0xfb   : > { %v636_v15 = vadd.f32 %v2242_v32, %v635_v14  ;;  %v819_v9 = vmax.f32 %v729_v7, 0.0 }
  0xfd   : > { %v782_v17 = vmax.f32 %v636_v15, 0.0 }
  0xff   : > { %v841_v18 = vpack.c.bf16 %v782_v17, %v781_v16 }
 0x100   : > { %v730_v4 = vpop.f32.mrf.mxu2 }
 0x101   : > { %965 = vmatmul.bf16.gmra.mxu1 %v841_v18  ;;  %v731_v8 = vadd.f32 %v2242_v32, %v730_v4 }
 0x102   : > { %v638_v21 = vpop.f32.mrf.mxu0 }
 0x103   : > { %v639_v28 = vadd.f32 %v2242_v32, %v638_v21  ;;  %v820_v10 = vmax.f32 %v731_v8, 0.0  ;;  %v1911_v21 = vld [vmem:[%s2198_s19 + $0x88] sm:$0xff]  ;;  %s2031_s19 = scalar_lea.hbm %s2030_s23, 4 }
 0x104   : > { %p2032_p11 = scmp.ne.s32.totalorder %s2030_s23, %s2031_s19  ;;  %p2037_p1 = scmp.lt.s32.totalorder %s2035_s30, %s2031_s19 }
 0x105   : > { %677 = vmatmul.bf16.gmra.mxu0 %v1907_v19  ;;  %v783_v33 = vmax.f32 %v639_v28, 0.0  ;;  %v860_v11 = vpack.c.bf16 %v820_v10, %v819_v9 }
 0x106   : > { %p2033_p12 = pnand %p2032_p11, %p2160_p5  ;;  %p2038_p2 = por %p2037_p1, %p2036_p0 }
 0x107   : > { %1060 = vmatmul.bf16.gmra.mxu3 %v860_v11 }
 0x108   : > { %v733_v13 = vpop.f32.mrf.mxu2  ;;  %p2034_p13 = pneg %p2033_p12 }
 0x109   : > { %v734_v23 = vadd.f32 %v2242_v32, %v733_v13 }
 0x10a   : > { %v640_v30 = vpop.f32.mrf.mxu0  ;;  %p2039_p3 = pnand %p2038_p2, %p2034_p13 }
 0x10b   : > { %v641_v31 = vadd.f32 %v2242_v32, %v640_v30  ;;  %v821_v25 = vmax.f32 %v734_v23, 0.0 }
 0x10d   : > { %v784_v34 = vmax.f32 %v641_v31, 0.0 }
 0x10f   : > { %v842_v35 = vpack.c.bf16 %v784_v34, %v783_v33 }
 0x110   : > { %v735_v20 = vpop.f32.mrf.mxu2 }
 0x111   : > { %970 = vmatmul.bf16.gmra.mxu1 %v842_v35  ;;  %v736_v24 = vadd.f32 %v2242_v32, %v735_v20 }
 0x112   : > { %v643_v38 = vpop.f32.mrf.mxu0 }
 0x113   : > { %v644_v45 = vadd.f32 %v2242_v32, %v643_v38  ;;  %v822_v26 = vmax.f32 %v736_v24, 0.0 }
 0x115   : > { %682 = vmatmul.bf16.gmra.mxu0 %v1908_v36  ;;  %v785_v49 = vmax.f32 %v644_v45, 0.0  ;;  %v861_v28 = vpack.c.bf16 %v822_v26, %v821_v25 }
 0x117   : > { %1065 = vmatmul.bf16.gmra.mxu3 %v861_v28 }
 0x118   : > { %v738_v30 = vpop.f32.mrf.mxu2 }
 0x119   : > { %v739_v41 = vadd.f32 %v2242_v32, %v738_v30 }
 0x11a   : > { %v645_v47 = vpop.f32.mrf.mxu0 }
 0x11b   : > { %v646_v48 = vadd.f32 %v2242_v32, %v645_v47  ;;  %v823_v43 = vmax.f32 %v739_v41, 0.0 }
 0x11d   : > { %v786_v50 = vmax.f32 %v646_v48, 0.0 }
 0x11f   : > { %v843_v51 = vpack.c.bf16 %v786_v50, %v785_v49 }
 0x120   : > { %v740_v38 = vpop.f32.mrf.mxu2 }
 0x121   : > { %975 = vmatmul.bf16.gmra.mxu1 %v843_v51  ;;  %v741_v42 = vadd.f32 %v2242_v32, %v740_v38 }
 0x122   : > { %v648_v54 = vpop.f32.mrf.mxu0 }
 0x123   : > { %v649_v61 = vadd.f32 %v2242_v32, %v648_v54  ;;  %v824_v44 = vmax.f32 %v741_v42, 0.0 }
 0x125   : > { %687 = vmatmul.bf16.gmra.mxu0 %v1909_v52  ;;  %v787_v1 = vmax.f32 %v649_v61, 0.0  ;;  %v862_v46 = vpack.c.bf16 %v824_v44, %v823_v43 }
 0x127   : > { %1070 = vmatmul.bf16.gmra.mxu3 %v862_v46 }
 0x128   : > { %v743_v48 = vpop.f32.mrf.mxu2 }
 0x129   : > { %v744_v57 = vadd.f32 %v2242_v32, %v743_v48 }
 0x12a   : > { %v650_v63 = vpop.f32.mrf.mxu0 }
 0x12b   : > { %v651_v0 = vadd.f32 %v2242_v32, %v650_v63  ;;  %v825_v59 = vmax.f32 %v744_v57, 0.0 }
 0x12d   : > { %v788_v2 = vmax.f32 %v651_v0, 0.0 }
 0x12f   : > { %v844_v3 = vpack.c.bf16 %v788_v2, %v787_v1 }
 0x130   : > { %v745_v55 = vpop.f32.mrf.mxu2 }
 0x131   : > { %980 = vmatmul.bf16.gmra.mxu1 %v844_v3  ;;  %v746_v58 = vadd.f32 %v2242_v32, %v745_v55 }
 0x132   : > { %v653_v6 = vpop.f32.mrf.mxu0 }
 0x133   : > { %v654_v12 = vadd.f32 %v2242_v32, %v653_v6  ;;  %v826_v60 = vmax.f32 %v746_v58, 0.0 }
 0x135   : > { %692 = vmatmul.bf16.gmra.mxu0 %v1910_v5  ;;  %v789_v16 = vmax.f32 %v654_v12, 0.0  ;;  %v863_v62 = vpack.c.bf16 %v826_v60, %v825_v59 }
 0x137   : > { %1075 = vmatmul.bf16.gmra.mxu3 %v863_v62 }
 0x138   : > { %v748_v0 = vpop.f32.mrf.mxu2 }
 0x139   : > { %v749_v9 = vadd.f32 %v2242_v32, %v748_v0 }
 0x13a   : > { %v655_v14 = vpop.f32.mrf.mxu0 }
 0x13b   : > { %v656_v15 = vadd.f32 %v2242_v32, %v655_v14  ;;  %v827_v11 = vmax.f32 %v749_v9, 0.0 }
 0x13d   : > { %v790_v17 = vmax.f32 %v656_v15, 0.0 }
 0x13e   : > { %v2287_v18 = vpop.f32.mrf.mxu1 }
 0x13f   : > { %v845_v19 = vpack.c.bf16 %v790_v17, %v789_v16 }
 0x140   : > { %v750_v7 = vpop.f32.mrf.mxu2 }
 0x141   : > { %985 = vmatmul.bf16.gmra.mxu1 %v845_v19  ;;  %v751_v10 = vadd.f32 %v2242_v32, %v750_v7 }
 0x142   : > { %v658_v22 = vpop.f32.mrf.mxu0 }
 0x143   : > { %v659_v29 = vadd.f32 %v2242_v32, %v658_v22  ;;  %v828_v12 = vmax.f32 %v751_v10, 0.0 }
 0x145   : > { %697 = vmatmul.bf16.gmra.mxu0 %v1911_v21  ;;  %v791_v34 = vmax.f32 %v659_v29, 0.0  ;;  %v864_v14 = vpack.c.bf16 %v828_v12, %v827_v11 }
 0x146   : > { %v2292_v27 = vpop.f32.mrf.mxu1 }
 0x147   : > { %1080 = vmatmul.bf16.gmra.mxu3 %v864_v14 }
 0x148   : > { %v753_v16 = vpop.f32.mrf.mxu2 }
 0x149   : > { %v754_v28 = vadd.f32 %v2242_v32, %v753_v16 }
 0x14a   : > { %v660_v31 = vpop.f32.mrf.mxu0  ;;  %v2321_v20 = vpop.f32.mrf.mxu3 }
 0x14b   : > { %v661_v33 = vadd.f32 %v2242_v32, %v660_v31  ;;  %v829_v31 = vmax.f32 %v754_v28, 0.0 }
 0x14d   : > { %v792_v35 = vmax.f32 %v661_v33, 0.0 }
 0x14e   : > { %v2296_v36 = vpop.f32.mrf.mxu1 }
 0x14f   : > { %v846_v37 = vpack.c.bf16 %v792_v35, %v791_v34 }
 0x150   : > { %v755_v25 = vpop.f32.mrf.mxu2 }
 0x151   : > { %990 = vmatmul.bf16.gmra.mxu1 %v846_v37  ;;  %v756_v29 = vadd.f32 %v2242_v32, %v755_v25 }
 0x152   : > { %v663_v40 = vpop.f32.mrf.mxu0  ;;  %v2327_v30 = vpop.f32.mrf.mxu3 }
 0x153   : > { %v664_v47 = vadd.f32 %v2242_v32, %v663_v40  ;;  %v830_v33 = vmax.f32 %v756_v29, 0.0 }
 0x155   : > { %702 = vmatmul.bf16.gmra.mxu0 %v1912_v39  ;;  %v793_v51 = vmax.f32 %v664_v47, 0.0  ;;  %v865_v35 = vpack.c.bf16 %v830_v33, %v829_v31 }
 0x156   : > { %v2301_v45 = vpop.f32.mrf.mxu1 }
 0x157   : > { %1085 = vmatmul.bf16.gmra.mxu3 %v865_v35 }
 0x158   : > { %v758_v38 = vpop.f32.mrf.mxu2 }
 0x15a   : > { %v665_v49 = vpop.f32.mrf.mxu0  ;;  %v2333_v41 = vpop.f32.mrf.mxu3 }
 0x15b   : > { %v666_v50 = vadd.f32 %v2242_v32, %v665_v49  ;;  %v759_v49 = vadd.f32 %v2242_v32, %v758_v38 }
 0x15d   : > { %v794_v52 = vmax.f32 %v666_v50, 0.0 }
 0x15e   : > { %v2305_v53 = vpop.f32.mrf.mxu1 }
 0x15f   : > { %v847_v54 = vpack.c.bf16 %v794_v52, %v793_v51  ;;  %v831_v52 = vmax.f32 %v759_v49, 0.0 }
 0x160   : > { %v760_v47 = vpop.f32.mrf.mxu2 }
 0x161   : > { %995 = vmatmul.bf16.gmra.mxu1 %v847_v54  ;;  %v761_v50 = vadd.f32 %v2242_v32, %v760_v47 }
 0x162   : > { %v668_v56 = vpop.f32.mrf.mxu0  ;;  %v2339_v51 = vpop.f32.mrf.mxu3 }
 0x163   : > { %v669_v63 = vadd.f32 %v2242_v32, %v668_v56  ;;  %v832_v54 = vmax.f32 %v761_v50, 0.0 }
 0x165   : > { %v795_v3 = vmax.f32 %v669_v63, 0.0  ;;  %v866_v56 = vpack.c.bf16 %v832_v54, %v831_v52 }
 0x166   : > { %v2309_v61 = vpop.f32.mrf.mxu1 }
 0x167   : > { %1090 = vmatmul.bf16.gmra.mxu3 %v866_v56 }
 0x168   : > { %v763_v58 = vpop.f32.mrf.mxu2 }
 0x16a   : > { %v670_v1 = vpop.f32.mrf.mxu0  ;;  %v2345_v0 = vpop.f32.mrf.mxu3 }
 0x16b   : > { %v671_v2 = vadd.f32 %v2242_v32, %v670_v1 }
 0x16d   : > { %v796_v4 = vmax.f32 %v671_v2, 0.0 }
 0x16e   : > { %v2313_v5 = vpop.f32.mrf.mxu1 }
 0x16f   : > { %v848_v6 = vpack.c.bf16 %v796_v4, %v795_v3 }
 0x170   : > { %v765_v3 = vpop.f32.mrf.mxu2 }
 0x171   : > { %1000 = vmatmul.bf16.gmra.mxu1 %v848_v6  ;;  %v764_v6 = vadd.f32 %v2242_v32, %v763_v58  ;;  %v766_v7 = vadd.f32 %v2242_v32, %v765_v3 }
 0x172   : > { %v673_v8 = vpop.f32.mrf.mxu0  ;;  %v2349_v12 = vpop.f32.mrf.mxu3 }
 0x173   : > { %v674_v15 = vadd.f32 %v2242_v32, %v673_v8  ;;  %v833_v8 = vmax.f32 %v764_v6, 0.0  ;;  %v834_v9 = vmax.f32 %v766_v7, 0.0 }
 0x175   : > { %v797_v21 = vmax.f32 %v674_v15, 0.0  ;;  %v867_v11 = vpack.c.bf16 %v834_v9, %v833_v8 }
 0x176   : > { %v2317_v13 = vpop.f32.mrf.mxu1 }
 0x177   : > { %1095 = vmatmul.bf16.gmra.mxu3 %v867_v11 }
 0x178   : > { %v768_v15 = vpop.f32.mrf.mxu2 }
 0x179   : > { %v769_v28 = vadd.f32 %v2242_v32, %v768_v15 }
 0x17a   : > { %v675_v17 = vpop.f32.mrf.mxu0  ;;  %v2353_v25 = vpop.f32.mrf.mxu3 }
 0x17b   : > { %v676_v19 = vadd.f32 %v2242_v32, %v675_v17  ;;  %v835_v33 = vmax.f32 %v769_v28, 0.0 }
 0x17d   : > { %v798_v22 = vmax.f32 %v676_v19, 0.0 }
 0x17e   : > { %v2323_v23 = vpop.f32.mrf.mxu1 }
 0x17f   : > { %v849_v24 = vpack.c.bf16 %v798_v22, %v797_v21 }
 0x181   : > { %1005 = vmatmul.bf16.gmra.mxu1 %v849_v24 }
 0x182   : > { %v678_v26 = vpop.f32.mrf.mxu0 }
 0x183   : > { %v679_v37 = vadd.f32 %v2242_v32, %v678_v26  ;;  %v770_v26 = vpop.f32.mrf.mxu2 }
 0x184   : > { %v771_v29 = vadd.f32 %v2242_v32, %v770_v26 }
 0x185   : > { %v799_v42 = vmax.f32 %v679_v37, 0.0  ;;  %v2360_v37 = vld [vmem:[%s2656_s4] ss:$0 sm:$0xff] }
 0x186   : > { %v2329_v34 = vpop.f32.mrf.mxu1  ;;  %v836_v35 = vmax.f32 %v771_v29, 0.0  ;;  %v962_v28 = vadd.f32 %v2360_v37, %v2313_v5  ;;  %v957_v5 = vadd.f32 %v2360_v37, %v2305_v53  ;;  %v949_v53 = vadd.f32 %v2360_v37, %v2292_v27 }
 0x18a   : > { %v680_v39 = vpop.f32.mrf.mxu0 }
 0x18b   : > { %v681_v40 = vadd.f32 %v2242_v32, %v680_v39  ;;  %v868_v39 = vpack.c.bf16 %v836_v35, %v835_v33 }
 0x18d   : > { %v800_v43 = vmax.f32 %v681_v40, 0.0  ;;  %1100 = vmatmul.bf16.gmra.mxu3 %v868_v39 }
 0x18e   : > { %v2335_v44 = vpop.f32.mrf.mxu1 }
 0x18f   : > { %v850_v46 = vpack.c.bf16 %v800_v43, %v799_v42  ;;  %v972_v7 = vadd.f32 %v2360_v37, %v2335_v44  ;;  %v967_v44 = vadd.f32 %v2360_v37, %v2323_v23 }
 0x191   : > { %1010 = vmatmul.bf16.gmra.mxu1 %v850_v46  ;;  %v1116_v11 = vmax.f32 %v972_v7, 0.0 }
 0x192   : > { %v683_v48 = vpop.f32.mrf.mxu0 }
 0x193   : > { %v684_v57 = vadd.f32 %v2242_v32, %v683_v48  ;;  %v2366_v48 = vpop.f32.mrf.mxu3 }
 0x195   : > { %v801_v62 = vmax.f32 %v684_v57, 0.0 }
 0x196   : > { %v2341_v55 = vpop.f32.mrf.mxu1 }
 0x19a   : > { %v685_v59 = vpop.f32.mrf.mxu0 }
 0x19b   : > { %v686_v60 = vadd.f32 %v2242_v32, %v685_v59  ;;  %v1061_v3 = vpop.f32.mrf.mxu3 }
 0x19d   : > { %v802_v63 = vmax.f32 %v686_v60, 0.0 }
 0x19e   : > { %v976_v1 = vpop.f32.mrf.mxu1 }
 0x19f   : > { %v851_v2 = vpack.c.bf16 %v802_v63, %v801_v62  ;;  %v977_v59 = vadd.f32 %v2360_v37, %v976_v1  ;;  %v974_v63 = vadd.f32 %v2360_v37, %v2341_v55  ;;  %v969_v55 = vadd.f32 %v2360_v37, %v2329_v34 }
 0x1a0   : > { %v1114_v34 = vmax.f32 %v967_v44, 0.0 }
 0x1a1   : > { %1015 = vmatmul.bf16.gmra.mxu1 %v851_v2  ;;  %v1118_v2 = vmax.f32 %v977_v59, 0.0  ;;  %v1117_v1 = vmax.f32 %v974_v63, 0.0 }
 0x1a2   : > { %v688_v4 = vpop.f32.mrf.mxu0 }
 0x1a3   : > { %v689_v14 = vadd.f32 %v2242_v32, %v688_v4 }
 0x1a5   : > { %v803_v19 = vmax.f32 %v689_v14, 0.0 }
 0x1a6   : > { %v978_v10 = vpop.f32.mrf.mxu1 }
 0x1a7   : > { %v979_v52 = vadd.f32 %v2360_v37, %v978_v10 }
 0x1a9   : > { %v1119_v60 = vmax.f32 %v979_v52, 0.0 }
 0x1aa   : > { %v690_v16 = vpop.f32.mrf.mxu0 }
 0x1ab   : > { %v691_v17 = vadd.f32 %v2242_v32, %v690_v16  ;;  %v1063_v16 = vpop.f32.mrf.mxu3 }
 0x1ac   : > { %v1064_v59 = vadd.f32 %v2360_v37, %v1063_v16 }
 0x1ad   : > { %v804_v21 = vmax.f32 %v691_v17, 0.0 }
 0x1ae   : > { %v981_v22 = vpop.f32.mrf.mxu1 }
 0x1af   : > { %v852_v24 = vpack.c.bf16 %v804_v21, %v803_v19  ;;  %v982_v43 = vadd.f32 %v2360_v37, %v981_v22  ;;  %v1115_v19 = vmax.f32 %v969_v55, 0.0  ;;  %v964_v22 = vadd.f32 %v2360_v37, %v2317_v13 }
 0x1b0   : > { %v959_v13 = vadd.f32 %v2360_v37, %v2309_v61  ;;  %v1110_v61 = vmax.f32 %v957_v5, 0.0 }
 0x1b1   : > { %1020 = vmatmul.bf16.gmra.mxu1 %v852_v24  ;;  %v1120_v54 = vmax.f32 %v982_v43, 0.0  ;;  %v1113_v29 = vmax.f32 %v964_v22, 0.0 }
 0x1b2   : > { %v693_v31 = vpop.f32.mrf.mxu0  ;;  %v1111_v43 = vmax.f32 %v959_v13, 0.0 }
 0x1b3   : > { %v694_v42 = vadd.f32 %v2242_v32, %v693_v31  ;;  %v2401_v23 = vpop.f32.mrf.mxu3 }
 0x1b5   : > { %v805_v49 = vmax.f32 %v694_v42, 0.0 }
 0x1b6   : > { %v983_v38 = vpop.f32.mrf.mxu1 }
 0x1b7   : > { %v984_v40 = vadd.f32 %v2360_v37, %v983_v38  ;;  %v1112_v38 = vmax.f32 %v962_v28, 0.0 }
 0x1b9   : > { %v1121_v46 = vmax.f32 %v984_v40, 0.0 }
 0x1ba   : > { %v695_v47 = vpop.f32.mrf.mxu0 }
 0x1bb   : > { %1818 = vmatpush.xpose.msk.msrb.mxu2 %vm1173_vm0, %v1121_v46  ;;  %v696_v50 = vadd.f32 %v2242_v32, %v695_v47  ;;  %v2413_v46 = vpop.f32.mrf.mxu3 }
 0x1bd   : > { %v806_v56 = vmax.f32 %v696_v50, 0.0 }
 0x1be   : > { %v2370_v57 = vpop.f32.mrf.mxu1 }
 0x1bf   : > { %1819 = vmatpush.xpose.msk.msrb.mxu2 %vm1173_vm0, %v1120_v54  ;;  %v853_v58 = vpack.c.bf16 %v806_v56, %v805_v49  ;;  %v952_v49 = vadd.f32 %v2360_v37, %v2296_v36 }
 0x1c1   : > { %1025 = vmatmul.bf16.gmra.mxu1 %v853_v58  ;;  %v1108_v52 = vmax.f32 %v952_v49, 0.0  ;;  %v1107_v58 = vmax.f32 %v949_v53, 0.0 }
 0x1c2   : > { %v698_v62 = vpop.f32.mrf.mxu0 }
 0x1c3   : > { %1820 = vmatpush.xpose.msk.msrb.mxu2 %vm1173_vm0, %v1119_v60  ;;  %v699_v6 = vadd.f32 %v2242_v32, %v698_v62  ;;  %v2425_v54 = vpop.f32.mrf.mxu3  ;;  %v1062_v60 = vadd.f32 %v2360_v37, %v1061_v3  ;;  %v1153_v62 = vmax.f32 %v1064_v59, 0.0 }
 0x1c5   : > { %v807_v9 = vmax.f32 %v699_v6, 0.0  ;;  %v1057_v6 = vadd.f32 %v2360_v37, %v2353_v25  ;;  %v1049_v25 = vadd.f32 %v2360_v37, %v2339_v51  ;;  %v1042_v51 = vadd.f32 %v2360_v37, %v2321_v20 }
 0x1c6   : > { %v2377_v4 = vpop.f32.mrf.mxu1 }
 0x1c7   : > { %1821 = vmatpush.xpose.msk.msrb.mxu2 %vm1173_vm0, %v1118_v2  ;;  %v1152_v2 = vmax.f32 %v1062_v60, 0.0  ;;  %v1147_v16 = vmax.f32 %v1049_v25, 0.0 }
 0x1ca   : > { %v700_v8 = vpop.f32.mrf.mxu0 }
 0x1cb   : > { %1822 = vmatpush.xpose.msk.msrb.mxu2 %vm1173_vm0, %v1117_v1  ;;  %v701_v10 = vadd.f32 %v2242_v32, %v700_v8  ;;  %v2438_v63 = vpop.f32.mrf.mxu3  ;;  %v1054_v8 = vadd.f32 %v2360_v37, %v2349_v12  ;;  %v1047_v12 = vadd.f32 %v2360_v37, %v2333_v41  ;;  %v1144_v41 = vmax.f32 %v1042_v51, 0.0 }
 0x1cd   : > { %v808_v14 = vmax.f32 %v701_v10, 0.0  ;;  %v1149_v10 = vmax.f32 %v1054_v8, 0.0  ;;  %v1146_v44 = vmax.f32 %v1047_v12, 0.0 }
 0x1ce   : > { %v2387_v15 = vpop.f32.mrf.mxu1 }
 0x1cf   : > { %1823 = vmatpush.xpose.msk.msrb.mxu2 %vm1173_vm0, %v1116_v11  ;;  %v854_v17 = vpack.c.bf16 %v808_v14, %v807_v9  ;;  %v1150_v9 = vmax.f32 %v1057_v6, 0.0 }
 0x1d1   : > { %1030 = vmatmul.bf16.gmra.mxu1 %v854_v17 }
 0x1d2   : > { %v703_v21 = vpop.f32.mrf.mxu0 }
 0x1d3   : > { %1824 = vmatpush.xpose.msk.msrb.mxu2 %vm1173_vm0, %v1115_v19  ;;  %v704_v26 = vadd.f32 %v2242_v32, %v703_v21  ;;  %v2447_v1 = vpop.f32.mrf.mxu3 }
 0x1d5   : > { %v809_v33 = vmax.f32 %v704_v26, 0.0 }
 0x1d6   : > { %v2395_v24 = vpop.f32.mrf.mxu1 }
 0x1d7   : > { %1825 = vmatpush.xpose.msk.msrb.mxu2 %vm1173_vm0, %v1114_v34 }
 0x1da   : > { %v705_v31 = vpop.f32.mrf.mxu0 }
 0x1db   : > { %1826 = vmatpush.xpose.msk.msrb.mxu2 %vm1173_vm0, %v1113_v29  ;;  %v706_v35 = vadd.f32 %v2242_v32, %v705_v31  ;;  %v954_v32 = vadd.f32 %v2360_v37, %v2301_v45  ;;  %v947_v45 = vadd.f32 %v2360_v37, %v2287_v18  ;;  %v1059_v18 = vadd.f32 %v2360_v37, %v2366_v48  ;;  %v2457_v14 = vpop.f32.mrf.mxu3 }
 0x1dc   : > { %v1052_v48 = vadd.f32 %v2360_v37, %v2345_v0  ;;  %v1044_v0 = vadd.f32 %v2360_v37, %v2327_v30 }
 0x1dd   : > { %v810_v39 = vmax.f32 %v706_v35, 0.0  ;;  %v1109_v50 = vmax.f32 %v954_v32, 0.0  ;;  %v1106_v36 = vmax.f32 %v947_v45, 0.0  ;;  %v1151_v7 = vmax.f32 %v1059_v18, 0.0 }
 0x1de   : > { %v2407_v40 = vpop.f32.mrf.mxu1  ;;  %v1148_v11 = vmax.f32 %v1052_v48, 0.0  ;;  %v1145_v21 = vmax.f32 %v1044_v0, 0.0  ;;  %v992_v0 = vadd.f32 %v2360_v37, %v2387_v15  ;;  %v987_v15 = vadd.f32 %v2360_v37, %v2370_v57 }
 0x1df   : > { %1827 = vmatpush.xpose.msk.msrb.mxu2 %vm1173_vm0, %v1112_v38  ;;  %v855_v42 = vpack.c.bf16 %v810_v39, %v809_v33 }
 0x1e1   : > { %1035 = vmatmul.bf16.gmra.mxu1 %v855_v42 }
 0x1e3   : > { %1828 = vmatpush.xpose.msk.msrb.mxu2 %vm1173_vm0, %v1111_v43  ;;  %v2466_v19 = vpop.f32.mrf.mxu3 }
 0x1e6   : > { %v2417_v47 = vpop.f32.mrf.mxu1 }
 0x1e7   : > { %1829 = vmatpush.xpose.msk.msrb.mxu2 %vm1173_vm0, %v1110_v61 }
 0x1eb   : > { %1830 = vmatpush.xpose.msk.msrb.mxu2 %vm1173_vm0, %v1109_v50  ;;  %v2472_v26 = vpop.f32.mrf.mxu3 }
 0x1ee   : > { %v2427_v56 = vpop.f32.mrf.mxu1 }
 0x1ef   : > { %1831 = vmatpush.xpose.msk.msrb.mxu2 %vm1173_vm0, %v1108_v52  ;;  %v1002_v8 = vadd.f32 %v2360_v37, %v2427_v56  ;;  %v994_v56 = vadd.f32 %v2360_v37, %v2395_v24  ;;  %v989_v24 = vadd.f32 %v2360_v37, %v2377_v4  ;;  %v1122_v4 = vmax.f32 %v987_v15, 0.0 }
 0x1f3   : > { %1832 = vmatpush.xpose.msk.msrb.mxu2 %vm1173_vm0, %v1107_v58  ;;  %v2474_v30 = vpop.f32.mrf.mxu3 }
 0x1f6   : > { %v2435_v27 = vpop.f32.mrf.mxu1 }
 0x1f7   : > { %1833 = vmatpush.xpose.msk.msrb.mxu2 %vm1173_vm0, %v1106_v36 }
 0x1fb   : > { %1852 = vmatpush.xpose.msk.msra.mxu2 %vm1173_vm0, %v1153_v62  ;;  %v2476_v31 = vpop.f32.mrf.mxu3 }
 0x1fe   : > { %v1006_v3 = vpop.f32.mrf.mxu1 }
 0x1ff   : > { %1853 = vmatpush.xpose.msk.msra.mxu2 %vm1173_vm0, %v1152_v2  ;;  %v1007_v60 = vadd.f32 %v2360_v37, %v1006_v3  ;;  %v1004_v2 = vadd.f32 %v2360_v37, %v2435_v27  ;;  %v999_v3 = vadd.f32 %v2360_v37, %v2417_v47  ;;  %v997_v27 = vadd.f32 %v2360_v37, %v2407_v40 }
 0x201   : > { %v1130_v6 = vmax.f32 %v1007_v60, 0.0  ;;  %v1127_v25 = vmax.f32 %v999_v3, 0.0 }
 0x203   : > { %1854 = vmatpush.xpose.msk.msra.mxu2 %vm1173_vm0, %v1151_v7  ;;  %v2482_v42 = vpop.f32.mrf.mxu3 }
 0x206   : > { %v1008_v55 = vpop.f32.mrf.mxu1 }
 0x207   : > { %1855 = vmatpush.xpose.msk.msra.mxu2 %vm1173_vm0, %v1150_v9  ;;  %v1009_v58 = vadd.f32 %v2360_v37, %v1008_v55  ;;  %v1129_v9 = vmax.f32 %v1004_v2, 0.0  ;;  %v1082_v2 = vadd.f32 %v2360_v37, %v2466_v19  ;;  %v1072_v19 = vadd.f32 %v2360_v37, %v2425_v54 }
 0x209   : > { %v1131_v62 = vmax.f32 %v1009_v58, 0.0  ;;  %v1092_v58 = vadd.f32 %v2360_v37, %v2482_v42  ;;  %v1084_v42 = vadd.f32 %v2360_v37, %v2472_v26  ;;  %v1074_v26 = vadd.f32 %v2360_v37, %v2438_v63 }
 0x20a   : > { %v1156_v3 = vmax.f32 %v1072_v19, 0.0 }
 0x20b   : > { %1856 = vmatpush.xpose.msk.msra.mxu2 %vm1173_vm0, %v1149_v10  ;;  %v2491_v53 = vpop.f32.mrf.mxu3  ;;  %v1128_v10 = vmax.f32 %v1002_v8, 0.0  ;;  %v1164_v60 = vmax.f32 %v1092_v58, 0.0 }
 0x20e   : > { %v1011_v17 = vpop.f32.mrf.mxu1 }
 0x20f   : > { %1857 = vmatpush.xpose.msk.msra.mxu2 %vm1173_vm0, %v1148_v11  ;;  %v1012_v52 = vadd.f32 %v2360_v37, %v1011_v17  ;;  %v1126_v11 = vmax.f32 %v997_v27, 0.0 }
 0x211   : > { %v1132_v59 = vmax.f32 %v1012_v52, 0.0  ;;  %v1170_v52 = vld [vmem:[%s2657_s5] sm:$0x1] }
 0x212   : > { %1834 = vmatmul.msk.f32.vlgmr.msrb.gmra.mxu2 %vm1173_vm0, %v1170_v52 }
 0x213   : > { %1858 = vmatpush.xpose.msk.msra.mxu2 %vm1173_vm0, %v1147_v16  ;;  %v1096_v18 = vpop.f32.mrf.mxu3 }
 0x216   : > { %v1013_v22 = vpop.f32.mrf.mxu1 }
 0x217   : > { %1859 = vmatpush.xpose.msk.msra.mxu2 %vm1173_vm0, %v1146_v44  ;;  %v1014_v61 = vadd.f32 %v2360_v37, %v1013_v22  ;;  %v1125_v44 = vmax.f32 %v994_v56, 0.0  ;;  %v1124_v22 = vmax.f32 %v992_v0, 0.0 }
 0x219   : > { %v1133_v45 = vmax.f32 %v1014_v61, 0.0 }
 0x21b   : > { %1860 = vmatpush.xpose.msk.msra.mxu2 %vm1173_vm0, %v1145_v21  ;;  %v1098_v48 = vpop.f32.mrf.mxu3 }
 0x21e   : > { %v1016_v34 = vpop.f32.mrf.mxu1 }
 0x21f   : > { %1861 = vmatpush.xpose.msk.msra.mxu2 %vm1173_vm0, %v1144_v41  ;;  %v1017_v43 = vadd.f32 %v2360_v37, %v1016_v34 }
 0x221   : > { %v1134_v49 = vmax.f32 %v1017_v43, 0.0  ;;  %v1099_v43 = vadd.f32 %v2360_v37, %v1098_v48  ;;  %v1157_v48 = vmax.f32 %v1074_v26, 0.0 }
 0x223   : > { %v1101_v12 = vpop.f32.mrf.mxu3 }
 0x226   : > { %v1018_v28 = vpop.f32.mrf.mxu1 }
 0x227   : > { %v1019_v38 = vadd.f32 %v2360_v37, %v1018_v28 }
 0x229   : > { %v1135_v32 = vmax.f32 %v1019_v38, 0.0 }
 0x22b   : > { %v1103_v41 = vpop.f32.mrf.mxu3 }
 0x22e   : > { %v1021_v29 = vpop.f32.mrf.mxu1 }
 0x22f   : > { %v1022_v20 = vadd.f32 %v2360_v37, %v1021_v29  ;;  %v1123_v29 = vmax.f32 %v989_v24, 0.0 }
 0x231   : > { %v1136_v39 = vmax.f32 %v1022_v20, 0.0 }
 0x236   : > { %v1023_v33 = vpop.f32.mrf.mxu1 }
 0x237   : > { %v1024_v35 = vadd.f32 %v2360_v37, %v1023_v33  ;;  %v1104_v33 = vadd.f32 %v2360_v37, %v1103_v41 }
 0x239   : > { %v1137_v13 = vmax.f32 %v1024_v35, 0.0  ;;  %v1169_v38 = vmax.f32 %v1104_v33, 0.0 }
 0x23b   : > { %1835 = vmatpush.xpose.msk.msrb.mxu3 %vm1173_vm0, %v1137_v13  ;;  %v1102_v13 = vadd.f32 %v2360_v37, %v1101_v12 }
 0x23e   : > { %v2484_v5 = vpop.f32.mrf.mxu1 }
 0x23f   : > { %1836 = vmatpush.xpose.msk.msrb.mxu3 %vm1173_vm0, %v1136_v39  ;;  %v1027_v57 = vadd.f32 %v2360_v37, %v2484_v5  ;;  %v1094_v5 = vadd.f32 %v2360_v37, %v2491_v53  ;;  %v1087_v53 = vadd.f32 %v2360_v37, %v2474_v30  ;;  %v1077_v30 = vadd.f32 %v2360_v37, %v2447_v1 }
 0x240   : > { %v1067_v1 = vadd.f32 %v2360_v37, %v2401_v23 }
 0x241   : > { %v1138_v61 = vmax.f32 %v1027_v57, 0.0 }
 0x242   : > { %v1154_v63 = vmax.f32 %v1067_v1, 0.0  ;;  %v1539_v1 = vlaneseq }
 0x243   : > { %1837 = vmatpush.xpose.msk.msrb.mxu3 %vm1173_vm0, %v1135_v32  ;;  %v1168_v32 = vmax.f32 %v1102_v13, 0.0 }
 0x246   : > { %v1028_v50 = vpop.f32.mrf.mxu1 }
 0x247   : > { %1838 = vmatpush.xpose.msk.msrb.mxu3 %vm1173_vm0, %v1134_v49  ;;  %v1029_v20 = vadd.f32 %v2360_v37, %v1028_v50  ;;  %v1097_v49 = vadd.f32 %v2360_v37, %v1096_v18  ;;  %v1167_v50 = vmax.f32 %v1099_v43, 0.0  ;;  %v1162_v18 = vmax.f32 %v1087_v53, 0.0 }
 0x249   : > { %v1139_v39 = vmax.f32 %v1029_v20, 0.0 }
 0x24b   : > { %1839 = vmatpush.xpose.msk.msrb.mxu3 %vm1173_vm0, %v1133_v45  ;;  %v1166_v45 = vmax.f32 %v1097_v49, 0.0 }
 0x24e   : > { %v1031_v36 = vpop.f32.mrf.mxu1 }
 0x24f   : > { %1840 = vmatpush.xpose.msk.msrb.mxu3 %vm1173_vm0, %v1132_v59  ;;  %v1032_v34 = vadd.f32 %v2360_v37, %v1031_v36  ;;  %v1165_v59 = vmax.f32 %v1094_v5, 0.0  ;;  %v1089_v36 = vadd.f32 %v2360_v37, %v2476_v31  ;;  %v1079_v31 = vadd.f32 %v2360_v37, %v2457_v14 }
 0x250   : > { %v1069_v14 = vadd.f32 %v2360_v37, %v2413_v46 }
 0x251   : > { %v1140_v35 = vmax.f32 %v1032_v34, 0.0  ;;  %v1159_v8 = vmax.f32 %v1079_v31, 0.0 }
 0x253   : > { %1841 = vmatpush.xpose.msk.msrb.mxu3 %vm1173_vm0, %v1131_v62  ;;  %v1163_v62 = vmax.f32 %v1089_v36, 0.0 }
 0x256   : > { %v1033_v7 = vpop.f32.mrf.mxu1 }
 0x257   : > { %1842 = vmatpush.xpose.msk.msrb.mxu3 %vm1173_vm0, %v1130_v6  ;;  %v1034_v51 = vadd.f32 %v2360_v37, %v1033_v7  ;;  %v1161_v6 = vmax.f32 %v1084_v42, 0.0  ;;  %v1160_v7 = vmax.f32 %v1082_v2, 0.0 }
 0x259   : > { %v1141_v28 = vmax.f32 %v1034_v51, 0.0 }
 0x25b   : > { %1843 = vmatpush.xpose.msk.msrb.mxu3 %vm1173_vm0, %v1129_v9  ;;  %v1158_v9 = vmax.f32 %v1077_v30, 0.0 }
 0x25e   : > { %v1036_v55 = vpop.f32.mrf.mxu1 }
 0x25f   : > { %1844 = vmatpush.xpose.msk.msrb.mxu3 %vm1173_vm0, %v1128_v10  ;;  %v1037_v47 = vadd.f32 %v2360_v37, %v1036_v55  ;;  %v1155_v10 = vmax.f32 %v1069_v14, 0.0  ;;  %v1172_v55 = vstv %s1171_s9 }
 0x261   : > { %v1142_v21 = vmax.f32 %v1037_v47, 0.0 }
 0x263   : > { %1845 = vmatpush.xpose.msk.msrb.mxu3 %vm1173_vm0, %v1127_v25 }
 0x266   : > { %v1038_v16 = vpop.f32.mrf.mxu1 }
 0x267   : > { %1846 = vmatpush.xpose.msk.msrb.mxu3 %vm1173_vm0, %v1126_v11  ;;  %v1039_v17 = vadd.f32 %v2360_v37, %v1038_v16 }
 0x269   : > { %v1143_v40 = vmax.f32 %v1039_v17, 0.0 }
 0x26b   : > { %1847 = vmatpush.xpose.msk.msrb.mxu3 %vm1173_vm0, %v1125_v44  ;;  %1862 = vmatpush.xpose.msk.msra.mxu2 %vm1173_vm0, %v1143_v40 }
 0x26f   : > { %1848 = vmatpush.xpose.msk.msrb.mxu3 %vm1173_vm0, %v1124_v22  ;;  %1863 = vmatpush.xpose.msk.msra.mxu2 %vm1173_vm0, %v1142_v21 }
 0x273   : > { %1849 = vmatpush.xpose.msk.msrb.mxu3 %vm1173_vm0, %v1123_v29  ;;  %1864 = vmatpush.xpose.msk.msra.mxu2 %vm1173_vm0, %v1141_v28 }
 0x277   : > { %1850 = vmatpush.xpose.msk.msrb.mxu3 %vm1173_vm0, %v1122_v4  ;;  %1865 = vmatpush.xpose.msk.msra.mxu2 %vm1173_vm0, %v1140_v35 }
 0x27a   : > { %1851 = vmatmul.msk.f32.vlgmr.msrb.gmra.mxu3 %vm1173_vm0, %v1170_v52 }
 0x27b   : > { %1869 = vmatpush.xpose.msk.msra.mxu3 %vm1173_vm0, %v1169_v38  ;;  %1866 = vmatpush.xpose.msk.msra.mxu2 %vm1173_vm0, %v1139_v39 }
 0x27f   : > { %1870 = vmatpush.xpose.msk.msra.mxu3 %vm1173_vm0, %v1168_v32  ;;  %1867 = vmatpush.xpose.msk.msra.mxu2 %vm1173_vm0, %v1138_v61 }
 0x282   : > { %1868 = vmatmul.msk.f32.vlgmr.msra.gmra.mxu2 %vm1173_vm0, %v1170_v52 }
 0x283   : > { %1871 = vmatpush.xpose.msk.msra.mxu3 %vm1173_vm0, %v1167_v50 }
 0x287   : > { %1872 = vmatpush.xpose.msk.msra.mxu3 %vm1173_vm0, %v1166_v45 }
 0x28b   : > { %1873 = vmatpush.xpose.msk.msra.mxu3 %vm1173_vm0, %v1165_v59 }
 0x28f   : > { %1874 = vmatpush.xpose.msk.msra.mxu3 %vm1173_vm0, %v1164_v60 }
 0x293   : > { %1875 = vmatpush.xpose.msk.msra.mxu3 %vm1173_vm0, %v1163_v62 }
 0x295   : > { %v1386_v54 = vpop.f32.mrf.mxu2 }
 0x296   : > { %v1387_v11 = vadd.f32 %v1386_v54, %v1172_v55 }
 0x297   : > { %1876 = vmatpush.xpose.msk.msra.mxu3 %vm1173_vm0, %v1162_v18 }
 0x298   : > { %v1886_v47 = vmul.f32 -1.442695, %v1387_v11 }
 0x29b   : > { %1877 = vmatpush.xpose.msk.msra.mxu3 %vm1173_vm0, %v1161_v6 }
 0x29f   : > { %1878 = vmatpush.xpose.msk.msra.mxu3 %vm1173_vm0, %v1160_v7 }
 0x2a3   : > { %1879 = vmatpush.xpose.msk.msra.mxu3 %vm1173_vm0, %v1159_v8 }
 0x2a7   : > { %1880 = vmatpush.xpose.msk.msra.mxu3 %vm1173_vm0, %v1158_v9 }
 0x2ab   : > { %1881 = vmatpush.xpose.msk.msra.mxu3 %vm1173_vm0, %v1157_v48 }
 0x2af   : > { %1882 = vmatpush.xpose.msk.msra.mxu3 %vm1173_vm0, %v1156_v3 }
 0x2b3   : > { %1883 = vmatpush.xpose.msk.msra.mxu3 %vm1173_vm0, %v1155_v10 }
 0x2b7   : > { %1884 = vmatpush.xpose.msk.msra.mxu3 %vm1173_vm0, %v1154_v63 }
 0x2ba   : > { %1885 = vmatmul.msk.f32.vlgmr.msra.gmra.mxu3 %vm1173_vm0, %v1170_v52 }
 0x2fd   : > { %v1406_v27 = vpop.f32.mrf.mxu3 }
 0x2fe   : > { %v1407_v46 = vadd.f32 %v1406_v27, %v1172_v55 }
 0x300   : > { %v1887_v12 = vmul.f32 -1.442695, %v1407_v46 }
 0x302   : > { %1999 = vpow2.f32 %v1887_v12 }
 0x305   : > { %v1426_v25 = vpop.f32.mrf.mxu2 }
 0x306   : > { %v1427_v56 = vadd.f32 %v1426_v25, %v1172_v55 }
 0x308   : > { %v1888_v16 = vmul.f32 -1.442695, %v1427_v56  ;;  %v2000_v37 = vpop.eup %1999 }
 0x309   : > { %v1462_v0 = vadd.f32 1.0, %v2000_v37 }
 0x30a   : > { %2001 = vpow2.f32 %v1888_v16 }
 0x30b   : > { %2003 = vpow2.f32 %v1886_v47  ;;  %vm1485_vm1 = vweird.f32 %v1462_v0  ;;  %v1491_v43 = vand.u32 2147483648, %v1462_v0  ;;  %v1489_v61 = vand.u32 2147483647, %v1462_v0 }
 0x30c   : > { %2005 = vrcp.f32 %v1462_v0 }
 0x30d   : > { %v1492_v36 = vor.u32 1.1754944e-38, %v1491_v43  ;;  %vm1490_vm9 = vcmp.eq.f32.partialorder %v1489_v61, 8.507059e+37 }
 0x310   : > { %v2002_v23 = vpop.eup %2001 }
 0x311   : > { %v2004_v17 = vpop.eup %2003  ;;  %v1463_v44 = vadd.f32 1.0, %v2002_v23 }
 0x312   : > { %v1461_v40 = vadd.f32 1.0, %v2004_v17  ;;  %v2006_v22 = vpop.eup %2005 }
 0x313   : > { %2007 = vrcp.f32 %v1463_v44  ;;  %v1481_v28 = vmul.f32 %v2006_v22, %v1462_v0  ;;  %vm1486_vm2 = vweird.f32 %v2006_v22  ;;  %vm1500_vm3 = vweird.f32 %v1463_v44 }
 0x314   : > { %2009 = vrcp.f32 %v1461_v40  ;;  %vm2592_vm5 = vmor %vm1485_vm1, %vm1486_vm2  ;;  %v1506_v52 = vand.u32 2147483648, %v1463_v44  ;;  %vm1470_vm7 = vweird.f32 %v1461_v40  ;;  %v1504_v59 = vand.u32 2147483647, %v1463_v44 }
 0x315   : > { %v1482_v35 = vsub.f32 1.0, %v1481_v28  ;;  %v1476_v53 = vand.u32 2147483648, %v1461_v40  ;;  %v1474_v42 = vand.u32 2147483647, %v1461_v40  ;;  %vm1532_vm1 = vcmask 1040384  }
 0x316   : > { %v1507_v2 = vor.u32 1.1754944e-38, %v1506_v52  ;;  %vm1505_vm12 = vcmp.eq.f32.partialorder %v1504_v59, 8.507059e+37  ;;  %vm1534_vm2 = vcmask 1042434  }
 0x317   : > { %v1483_v38 = vmul.f32 %v2006_v22, %v1482_v35  ;;  %v1477_v26 = vor.u32 1.1754944e-38, %v1476_v53  ;;  %vm1475_vm14 = vcmp.eq.f32.partialorder %v1474_v42, 8.507059e+37 }
 0x319   : > { %v2008_v41 = vpop.eup %2007  ;;  %v1484_v32 = vadd.f32 %v2006_v22, %v1483_v38 }
 0x31a   : > { %v2588_v34 = vpop.eup %2009  ;;  %v1496_v15 = vmul.f32 %v2008_v41, %v1463_v44  ;;  %vm1501_vm4 = vweird.f32 %v2008_v41 }
 0x31b   : > { %v1466_v29 = vmul.f32 %v2588_v34, %v1461_v40  ;;  %vm2596_vm6 = vmor %vm1500_vm3, %vm1501_vm4  ;;  %vm1471_vm8 = vweird.f32 %v2588_v34  ;;  %v1488_v18 = vsel %vm2592_vm5, %v2006_v22, %v1484_v32  ;;  %vm1536_vm3 = vcmask 1041408  }
 0x31c   : > { %v1497_v4 = vsub.f32 1.0, %v1496_v15  ;;  %vm2609_vm10 = vmor %vm1470_vm7, %vm1471_vm8  ;;  %v1493_v9 = vsel %vm1490_vm9, %v1492_v36, %v1488_v18  ;;  %vm1541_vm4 = vcmp.lt.s32.totalorder %v1539_v1, 512 }
 0x31d   : > { %v1467_v13 = vsub.f32 1.0, %v1466_v29  ;;  %v1529_v63 = vrot.slane %v1493_v9, 7 }
 0x31e   : > { %v1498_v57 = vmul.f32 %v2008_v41, %v1497_v4 }
 0x31f   : > { %v1468_v39 = vmul.f32 %v2588_v34, %v1467_v13 }
 0x320   : > { %v1499_v5 = vadd.f32 %v2008_v41, %v1498_v57 }
 0x321   : > { %v1469_v60 = vadd.f32 %v2588_v34, %v1468_v39 }
 0x322   : > { %v1503_v7 = vsel %vm2596_vm6, %v2008_v41, %v1499_v5 }
 0x323   : > { %v1473_v19 = vsel %vm2609_vm10, %v2588_v34, %v1469_v60  ;;  %v1508_v3 = vsel %vm1505_vm12, %v1507_v2, %v1503_v7 }
 0x324   : > { %v1478_v54 = vsel %vm1475_vm14, %v1477_v26, %v1473_v19  ;;  %v1530_v27 = vrot.slane %v1508_v3, 6 }
 0x325   : > { %v1533_v46 = vsel %vm1532_vm1, %v1478_v54, %v1529_v63 }
 0x33d   : > { %v1446_v51 = vpop.f32.mrf.mxu3 }
 0x33e   : > { %v1447_v21 = vadd.f32 %v1446_v51, %v1172_v55 }
 0x340   : > { %v1889_v24 = vmul.f32 -1.442695, %v1447_v21 }
 0x342   : > { %2011 = vpow2.f32 %v1889_v24 }
 0x348   : > { %v2012_v33 = vpop.eup %2011 }
 0x349   : > { %v1464_v20 = vadd.f32 1.0, %v2012_v33 }
 0x34b   : > { %2013 = vrcp.f32 %v1464_v20  ;;  %v1521_v6 = vand.u32 2147483648, %v1464_v20  ;;  %v1519_v8 = vand.u32 2147483647, %v1464_v20  ;;  %vm1515_vm13 = vweird.f32 %v1464_v20 }
 0x34d   : > { %v1522_v14 = vor.u32 1.1754944e-38, %v1521_v6  ;;  %vm1520_vm0 = vcmp.eq.f32.partialorder %v1519_v8, 8.507059e+37 }
 0x351   : > { %v2014_v49 = vpop.eup %2013 }
 0x352   : > { %v1511_v58 = vmul.f32 %v2014_v49, %v1464_v20  ;;  %vm1516_vm11 = vweird.f32 %v2014_v49 }
 0x353   : > { %vm1517_vm15 = vmor %vm1515_vm13, %vm1516_vm11 }
 0x354   : > { %v1512_v62 = vsub.f32 1.0, %v1511_v58 }
 0x356   : > { %v1513_v30 = vmul.f32 %v2014_v49, %v1512_v62 }
 0x358   : > { %v1514_v48 = vadd.f32 %v2014_v49, %v1513_v30 }
 0x35a   : > { %v1518_v10 = vsel %vm1517_vm15, %v2014_v49, %v1514_v48 }
 0x35b   : > { %v1523_v55 = vsel %vm1520_vm0, %v1522_v14, %v1518_v10 }
 0x35c   : > { %v1531_v25 = vrot.slane %v1523_v55, 5 }
 0x35e   : > { %v1535_v56 = vsel %vm1534_vm2, %v1530_v27, %v1531_v25 }
 0x35f   : > { %v1537_v11 = vsel %vm1536_vm3, %v1533_v46, %v1535_v56 }
 0x360   : > { %1543 = vst.msk [vmem:[%s273_s6] sm:$0xf] %vm1541_vm4, %v1537_v11 }
 0x361   : > { %2042 = shalt.err (!%p2039_p3)
}
 0x362   : > { %1958 = dma.vmem_to_hbm [thread:$0]  (%p2160_p5), %s1558_s20, 64, %s1560_s21, %s1545_s22  }
 0x363 PF: > { %p1964_p4 = scmp.ge.s32.totalorder %s2077_s29, 2  ;;  %s1571_s10 = sand.u32 1, %s2065_s26  }
 0x364   : > { %s1572_s15 = scalar_lea.sflag [#allocation4], %s1571_s10 }
 0x365   : > { %p1961_p7 = pnand %p1964_p4, %p2164_p6 }
 0x367   : > { %p1962_p8 = pneg %p1961_p7 }
 0x369   : > { %2060 = dma.done.wait (%p1962_p8), %s1572_s15, 64  }
 0x36a   : > { %2062 = vsyncadd (%p1962_p8), %s1572_s15, 4294967232  ;;  %p18_p9 = scmp.ge.s32.totalorder %s2147_s8, 4   ;;  %s2668_s26 = smov %s2069_s27 }
 0x36b   : > { %s2669_s27 = smov %s2073_s28  ;;  %s2670_s28 = smov %s2158_s11 }
 0x36c   : > { %s2671_s29 = smov %s2147_s8  ;;  %20 = sbr.rel (!%p18_p9) target bundleno = 5 (0x5), region = 83 }
 0x371   :  { %1578 = vsyncpa [#allocation4], 1 }
 0x372   :  { %1580 = vsyncpa [#allocation4 + $0x1], 1 }

</bundles_post_ra>
